<compile_context>
chip_gen: v6e
topology: v6e:2x2x1
jax: 0.10.0
libtpu: 0.0.40
codegen_flags: <defaults>
</compile_context>

<pallas_src>
import jax
import jax.numpy as jnp
from jax import lax
from jax.experimental import pallas as pl
from jax.experimental.pallas import tpu as pltpu


_OFF = 128  # lane offset of the activation buffer: keeps its big store
            # lane-aligned and leaves room for the conv2 tap at flat offset -1.


def _make_kernel(TH, W, C):
    Wp = W + 2                   # padded width (1 zero column each side)
    R1 = TH + 2                  # conv1 activation rows (1-row halo for conv2)
    L1 = R1 * Wp                 # conv1 output pixels (flat, incl. seam cols)
    L2 = TH * Wp                 # conv2 output pixels (flat, incl. seam cols)
    bf16 = jnp.bfloat16

    def kernel(x_ref, mask_ref, w1_ref, w2_ref, out_ref, col, mflat):
        # x_ref   : (1, 1, C, (TH+5)*Wp) f32   flattened padded input window
        # mask_ref: (1, L1) f32                1.0 on valid cols, 0.0 on seam cols
        # w1_ref  : (C, 9*C) bf16              conv1 weights, col = (dy*3+dx)*C + ci
        # w2_ref  : (C, 9*C) bf16              conv2 weights
        # out_ref : (1, 1, C, L2) f32          conv2 + identity (seam cols = junk)
        # col     : (9*C, L1) bf16             shared transposed im2col scratch
        # mflat   : (C, _OFF + L1 + 8) bf16    zero-padded conv1 activation
        h = pl.program_id(1)
        nH = pl.num_programs(1)

        # ---- conv1: 9 contiguous tap slabs -> one (C,9C)x(9C,L1) MXU matmul ----
        for k in range(9):
            dy, dx = divmod(k, 3)
            off = dy * Wp + dx
            col[k * C:(k + 1) * C, :] = x_ref[0, 0, :, off:off + L1].astype(bf16)
        a1 = jnp.dot(w1_ref[...], col[...], preferred_element_type=jnp.float32)

        # ---- LeakyReLU(0.2) + seam-column zeroing -> conv2's padded input ------
        act = jnp.where(a1 > 0, a1, 0.2 * a1) * mask_ref[...]
        mflat[:, _OFF:_OFF + L1] = act.astype(bf16)
        # flat offset -1 (left zero-padding of activation row 0) must be zero
        mflat[:, _OFF - 1:_OFF] = jnp.zeros((C, 1), bf16)

        # Activation rows outside the image use ZERO padding (not conv1-of-padding).
        @pl.when(h == 0)
        def _():
            mflat[:, _OFF:_OFF + Wp] = jnp.zeros((C, Wp), bf16)

        @pl.when(h == nH - 1)
        def _():
            mflat[:, _OFF + (R1 - 1) * Wp:_OFF + L1] = jnp.zeros((C, Wp), bf16)

        # ---- conv2: same flat-slab im2col (col scratch reused), one matmul -----
        for k in range(9):
            dy, dx = divmod(k, 3)
            off = _OFF + dy * Wp + dx - 1
            col[k * C:(k + 1) * C, 0:L2] = mflat[:, off:off + L2]
        a2 = jnp.dot(w2_ref[...], col[:, 0:L2], preferred_element_type=jnp.float32)

        # ---- residual add: identity is one contiguous slab of the input window -
        ident = x_ref[0, 0, :, 2 * Wp + 1:2 * Wp + 1 + L2]
        out_ref[0, 0, :, :] = (a2 + ident).astype(out_ref.dtype)

    return kernel


def _vmem_capacity_bytes():
    try:
        return int(pltpu.get_tpu_info().vmem_capacity_bytes)
    except Exception:
        return 64 * 1024 * 1024  # conservative default (v7x per-core VMEM)


def _vmem_need_bytes(TH, W, C):
    """Per-step VMEM estimate: double-buffered pipeline blocks, scratch buffers
    and the main matmul/activation temporaries."""
    Wp = W + 2
    L1 = (TH + 2) * Wp
    L2 = TH * Wp
    FR = (TH + 5) * Wp
    return (2 * C * FR * 4                 # input window block, double-buffered
            + 2 * C * L2 * 4               # output block, double-buffered
            + 2 * L1 * 4                   # seam mask, double-buffered
            + 2 * 2 * C * 9 * C * 2        # two bf16 weight slabs, double-buffered
            + 9 * C * L1 * 2               # col scratch (bf16)
            + C * (_OFF + L1 + 8) * 2      # activation scratch (bf16)
            + 4 * C * L1 * 4)              # a1/act/a2/identity f32 temporaries


def _choose_tile_h(H, W, C, budget_bytes):
    """Largest TH dividing H whose VMEM estimate fits the budget (no silent fallback)."""
    for th in range(H, 0, -1):
        if H % th == 0 and _vmem_need_bytes(th, W, C) <= budget_bytes:
            return th
    raise ValueError(
        f"no tile height fits the VMEM budget ({budget_bytes} B) for "
        f"H={H}, W={W}, C={C}")


def residual_block(x_nchw, w1_oihw, w2_oihw, tile_h=None):
    """Forward of _Residual_Block(norm=False). x: (N,C,H,W); weights: (C,C,3,3)."""
    N, C, H, W = x_nchw.shape
    Wp = W + 2

    capacity = _vmem_capacity_bytes()
    TH = tile_h if tile_h is not None else _choose_tile_h(H, W, C, int(0.4 * capacity))
    assert H % TH == 0
    nH = H // TH
    R1 = TH + 2
    L1 = R1 * Wp
    L2 = TH * Wp
    FR = (TH + 5) * Wp

    x = x_nchw.astype(jnp.float32)
    # Zero-pad once: 2 rows top, 3 rows bottom (the extra row keeps the flat-slab
    # im2col reads in bounds), 1 column each side.
    xp = jnp.pad(x, ((0, 0), (0, 0), (2, 3), (1, 1)))            # (N, C, H+5, Wp)
    # Overlapping per-tile row windows, flattened over (row, col) -> lane axis.
    xw = jnp.stack([xp[:, :, h * TH:h * TH + TH + 5, :] for h in range(nH)],
                   axis=1).reshape(N, nH, C, FR)

    # OIHW (C,C,3,3) -> (C_out, 9*C_in) bf16 slab, column index = (dy*3+dx)*C + ci.
    def prep_w(w):
        return jnp.transpose(w, (0, 2, 3, 1)).reshape(C, 9 * C).astype(jnp.bfloat16)

    w1 = prep_w(w1_oihw)
    w2 = prep_w(w2_oihw)

    # 1.0 on valid output columns, 0.0 on the 2 seam columns of every flat row.
    maskcol = (jnp.arange(L1, dtype=jnp.int32) % Wp < W)
    maskcol = maskcol.astype(jnp.float32).reshape(1, L1)

    out_flat = pl.pallas_call(
        _make_kernel(TH, W, C),
        out_shape=jax.ShapeDtypeStruct((N, nH, C, L2), jnp.float32),
        grid=(N, nH),
        in_specs=[
            pl.BlockSpec((1, 1, C, FR), lambda n, h: (n, h, 0, 0)),
            pl.BlockSpec((1, L1), lambda n, h: (0, 0)),
            pl.BlockSpec((C, 9 * C), lambda n, h: (0, 0)),
            pl.BlockSpec((C, 9 * C), lambda n, h: (0, 0)),
        ],
        out_specs=pl.BlockSpec((1, 1, C, L2), lambda n, h: (n, h, 0, 0)),
        scratch_shapes=[
            pltpu.VMEM((9 * C, L1), jnp.bfloat16),          # shared im2col scratch
            pltpu.VMEM((C, _OFF + L1 + 8), jnp.bfloat16),   # padded activation
        ],
        compiler_params=pltpu.CompilerParams(
            dimension_semantics=("parallel", "parallel"),
            vmem_limit_bytes=int(0.7 * capacity)),
    )(xw, maskcol, w1, w2)

    # Drop the 2 seam columns and reassemble NCHW (layout plumbing, outside kernel).
    out = out_flat.reshape(N, nH, C, TH, Wp)[:, :, :, :, 0:W]
    return jnp.transpose(out, (0, 2, 1, 3, 4)).reshape(N, C, H, W)


def _reference(x_nchw, w1_oihw, w2_oihw):
    """Pure-JAX reference mirroring the kernel's precision (bf16 MXU operands,
    f32 accumulation, f32 LeakyReLU / residual add)."""
    dn = ("NCHW", "OIHW", "NCHW")
    x = x_nchw.astype(jnp.float32)

    def conv(inp, w):
        return lax.conv_general_dilated(
            inp.astype(jnp.bfloat16), w.astype(jnp.bfloat16), (1, 1), "SAME",
            dimension_numbers=dn, preferred_element_type=jnp.float32)

    y = conv(x, w1_oihw)
    y = jnp.where(y > 0, y, 0.2 * y)
    y = conv(y, w2_oihw)
    return y + x


if __name__ == "__main__":
    key = jax.random.PRNGKey(0)
    k_x, k_w1, k_w2 = jax.random.split(key, 3)

    # Small shapes: batch=2, ngf=4 channels, 16x16 spatial.
    N, C, H, W = 2, 4, 16, 16
    x = jax.random.normal(k_x, (N, C, H, W), dtype=jnp.float32)
    # Deterministic synthetic conv weights (PyTorch OIHW shape: (ngf, ngf, 3, 3)).
    w1 = 0.1 * jax.random.normal(k_w1, (C, C, 3, 3), dtype=jnp.float32)
    w2 = 0.1 * jax.random.normal(k_w2, (C, C, 3, 3), dtype=jnp.float32)

    ref = jax.block_until_ready(_reference(x, w1, w2))

    # Single-tile path (TH = H).
    out = jax.block_until_ready(residual_block(x, w1, w2))
    assert out.shape == (N, C, H, W)
    assert jnp.allclose(out, ref, atol=1e-2, rtol=1e-2), "mismatch (single tile)"

    # Spatially-tiled path (TH=8 -> 2 row-tiles): exercises the overlapping-window
    # halo and the activation zero-padding at the image top/bottom.
    out_t = jax.block_until_ready(residual_block(x, w1, w2, tile_h=8))
    assert jnp.allclose(out_t, ref, atol=1e-2, rtol=1e-2), "mismatch (tiled)"

    print("KERNEL_OK")
</pallas_src>

<mosaic_0001>
module attributes {stable_mosaic.version = 11 : i64} {
  func.func @kernel(%arg0: i32, %arg1: i32, %arg2: memref<1x1x4x378xf32, #tpu.memory_space<vmem>>, %arg3: memref<1x324xf32, #tpu.memory_space<vmem>>, %arg4: memref<4x36xbf16, #tpu.memory_space<vmem>>, %arg5: memref<4x36xbf16, #tpu.memory_space<vmem>>, %arg6: memref<1x1x4x288xf32, #tpu.memory_space<vmem>>, %arg7: memref<36x324xbf16, #tpu.memory_space<vmem>>, %arg8: memref<4x460xbf16, #tpu.memory_space<vmem>>) attributes {dimension_semantics = [#tpu.dimension_semantics<parallel>, #tpu.dimension_semantics<parallel>], iteration_bounds = array<i64: 2, 1>, scalar_prefetch = 0 : i64, scratch_operands = 2 : i64, tpu.core_type = #tpu.core_type<tc>, window_params = [{transform_indices = @transform_0, window_bounds = array<i64: 1, 1, 4, 378>}, {pipeline_mode = #tpu.pipeline_mode<synchronous>, transform_indices = @transform_1, window_bounds = array<i64: 1, 324>}, {pipeline_mode = #tpu.pipeline_mode<synchronous>, transform_indices = @transform_2, window_bounds = array<i64: 4, 36>}, {pipeline_mode = #tpu.pipeline_mode<synchronous>, transform_indices = @transform_3, window_bounds = array<i64: 4, 36>}, {transform_indices = @transform_4, window_bounds = array<i64: 1, 1, 4, 288>}]} {
    %c0 = arith.constant 0 : index
    %c0_0 = arith.constant 0 : index
    %c0_1 = arith.constant 0 : index
    %c0_2 = arith.constant 0 : index
    %0 = vector.load %arg2[%c0, %c0_0, %c0_1, %c0_2] : memref<1x1x4x378xf32, #tpu.memory_space<vmem>>, vector<1x1x4x324xf32>
    %1 = vector.shape_cast %0 : vector<1x1x4x324xf32> to vector<4x324xf32>
    %2 = arith.truncf %1 : vector<4x324xf32> to vector<4x324xbf16>
    %c0_3 = arith.constant 0 : index
    %c0_4 = arith.constant 0 : index
    %3 = vector.load %arg7[%c0_3, %c0_4] : memref<36x324xbf16, #tpu.memory_space<vmem>>, vector<4x324xbf16>
    tpu.vector_store %arg7[%c0_3, %c0_4], %2 {strides = array<i32>} : memref<36x324xbf16, #tpu.memory_space<vmem>>, vector<4x324xbf16>,
    %c0_5 = arith.constant 0 : index
    %c0_6 = arith.constant 0 : index
    %c0_7 = arith.constant 0 : index
    %c1 = arith.constant 1 : index
    %4 = vector.load %arg2[%c0_5, %c0_6, %c0_7, %c1] : memref<1x1x4x378xf32, #tpu.memory_space<vmem>>, vector<1x1x4x324xf32>
    %5 = vector.shape_cast %4 : vector<1x1x4x324xf32> to vector<4x324xf32>
    %6 = arith.truncf %5 : vector<4x324xf32> to vector<4x324xbf16>
    %c4 = arith.constant 4 : index
    %c0_8 = arith.constant 0 : index
    %7 = vector.load %arg7[%c4, %c0_8] : memref<36x324xbf16, #tpu.memory_space<vmem>>, vector<4x324xbf16>
    tpu.vector_store %arg7[%c4, %c0_8], %6 {strides = array<i32>} : memref<36x324xbf16, #tpu.memory_space<vmem>>, vector<4x324xbf16>,
    %c0_9 = arith.constant 0 : index
    %c0_10 = arith.constant 0 : index
    %c0_11 = arith.constant 0 : index
    %c2 = arith.constant 2 : index
    %8 = vector.load %arg2[%c0_9, %c0_10, %c0_11, %c2] : memref<1x1x4x378xf32, #tpu.memory_space<vmem>>, vector<1x1x4x324xf32>
    %9 = vector.shape_cast %8 : vector<1x1x4x324xf32> to vector<4x324xf32>
    %10 = arith.truncf %9 : vector<4x324xf32> to vector<4x324xbf16>
    %c8 = arith.constant 8 : index
    %c0_12 = arith.constant 0 : index
    %11 = vector.load %arg7[%c8, %c0_12] : memref<36x324xbf16, #tpu.memory_space<vmem>>, vector<4x324xbf16>
    tpu.vector_store %arg7[%c8, %c0_12], %10 {strides = array<i32>} : memref<36x324xbf16, #tpu.memory_space<vmem>>, vector<4x324xbf16>,
    %c0_13 = arith.constant 0 : index
    %c0_14 = arith.constant 0 : index
    %c0_15 = arith.constant 0 : index
    %c18 = arith.constant 18 : index
    %12 = vector.load %arg2[%c0_13, %c0_14, %c0_15, %c18] : memref<1x1x4x378xf32, #tpu.memory_space<vmem>>, vector<1x1x4x324xf32>
    %13 = vector.shape_cast %12 : vector<1x1x4x324xf32> to vector<4x324xf32>
    %14 = arith.truncf %13 : vector<4x324xf32> to vector<4x324xbf16>
    %c12 = arith.constant 12 : index
    %c0_16 = arith.constant 0 : index
    %15 = vector.load %arg7[%c12, %c0_16] : memref<36x324xbf16, #tpu.memory_space<vmem>>, vector<4x324xbf16>
    tpu.vector_store %arg7[%c12, %c0_16], %14 {strides = array<i32>} : memref<36x324xbf16, #tpu.memory_space<vmem>>, vector<4x324xbf16>,
    %c0_17 = arith.constant 0 : index
    %c0_18 = arith.constant 0 : index
    %c0_19 = arith.constant 0 : index
    %c19 = arith.constant 19 : index
    %16 = vector.load %arg2[%c0_17, %c0_18, %c0_19, %c19] : memref<1x1x4x378xf32, #tpu.memory_space<vmem>>, vector<1x1x4x324xf32>
    %17 = vector.shape_cast %16 : vector<1x1x4x324xf32> to vector<4x324xf32>
    %18 = arith.truncf %17 : vector<4x324xf32> to vector<4x324xbf16>
    %c16 = arith.constant 16 : index
    %c0_20 = arith.constant 0 : index
    %19 = vector.load %arg7[%c16, %c0_20] : memref<36x324xbf16, #tpu.memory_space<vmem>>, vector<4x324xbf16>
    tpu.vector_store %arg7[%c16, %c0_20], %18 {strides = array<i32>} : memref<36x324xbf16, #tpu.memory_space<vmem>>, vector<4x324xbf16>,
    %c0_21 = arith.constant 0 : index
    %c0_22 = arith.constant 0 : index
    %c0_23 = arith.constant 0 : index
    %c20 = arith.constant 20 : index
    %20 = vector.load %arg2[%c0_21, %c0_22, %c0_23, %c20] : memref<1x1x4x378xf32, #tpu.memory_space<vmem>>, vector<1x1x4x324xf32>
    %21 = vector.shape_cast %20 : vector<1x1x4x324xf32> to vector<4x324xf32>
    %22 = arith.truncf %21 : vector<4x324xf32> to vector<4x324xbf16>
    %c20_24 = arith.constant 20 : index
    %c0_25 = arith.constant 0 : index
    %23 = vector.load %arg7[%c20_24, %c0_25] : memref<36x324xbf16, #tpu.memory_space<vmem>>, vector<4x324xbf16>
    tpu.vector_store %arg7[%c20_24, %c0_25], %22 {strides = array<i32>} : memref<36x324xbf16, #tpu.memory_space<vmem>>, vector<4x324xbf16>,
    %c0_26 = arith.constant 0 : index
    %c0_27 = arith.constant 0 : index
    %c0_28 = arith.constant 0 : index
    %c36 = arith.constant 36 : index
    %24 = vector.load %arg2[%c0_26, %c0_27, %c0_28, %c36] : memref<1x1x4x378xf32, #tpu.memory_space<vmem>>, vector<1x1x4x324xf32>
    %25 = vector.shape_cast %24 : vector<1x1x4x324xf32> to vector<4x324xf32>
    %26 = arith.truncf %25 : vector<4x324xf32> to vector<4x324xbf16>
    %c24 = arith.constant 24 : index
    %c0_29 = arith.constant 0 : index
    %27 = vector.load %arg7[%c24, %c0_29] : memref<36x324xbf16, #tpu.memory_space<vmem>>, vector<4x324xbf16>
    tpu.vector_store %arg7[%c24, %c0_29], %26 {strides = array<i32>} : memref<36x324xbf16, #tpu.memory_space<vmem>>, vector<4x324xbf16>,
    %c0_30 = arith.constant 0 : index
    %c0_31 = arith.constant 0 : index
    %c0_32 = arith.constant 0 : index
    %c37 = arith.constant 37 : index
    %28 = vector.load %arg2[%c0_30, %c0_31, %c0_32, %c37] : memref<1x1x4x378xf32, #tpu.memory_space<vmem>>, vector<1x1x4x324xf32>
    %29 = vector.shape_cast %28 : vector<1x1x4x324xf32> to vector<4x324xf32>
    %30 = arith.truncf %29 : vector<4x324xf32> to vector<4x324xbf16>
    %c28 = arith.constant 28 : index
    %c0_33 = arith.constant 0 : index
    %31 = vector.load %arg7[%c28, %c0_33] : memref<36x324xbf16, #tpu.memory_space<vmem>>, vector<4x324xbf16>
    tpu.vector_store %arg7[%c28, %c0_33], %30 {strides = array<i32>} : memref<36x324xbf16, #tpu.memory_space<vmem>>, vector<4x324xbf16>,
    %c0_34 = arith.constant 0 : index
    %c0_35 = arith.constant 0 : index
    %c0_36 = arith.constant 0 : index
    %c38 = arith.constant 38 : index
    %32 = vector.load %arg2[%c0_34, %c0_35, %c0_36, %c38] : memref<1x1x4x378xf32, #tpu.memory_space<vmem>>, vector<1x1x4x324xf32>
    %33 = vector.shape_cast %32 : vector<1x1x4x324xf32> to vector<4x324xf32>
    %34 = arith.truncf %33 : vector<4x324xf32> to vector<4x324xbf16>
    %c32 = arith.constant 32 : index
    %c0_37 = arith.constant 0 : index
    %35 = vector.load %arg7[%c32, %c0_37] : memref<36x324xbf16, #tpu.memory_space<vmem>>, vector<4x324xbf16>
    tpu.vector_store %arg7[%c32, %c0_37], %34 {strides = array<i32>} : memref<36x324xbf16, #tpu.memory_space<vmem>>, vector<4x324xbf16>,
    %c0_38 = arith.constant 0 : index
    %c0_39 = arith.constant 0 : index
    %36 = vector.load %arg4[%c0_38, %c0_39] : memref<4x36xbf16, #tpu.memory_space<vmem>>, vector<4x36xbf16>
    %c0_40 = arith.constant 0 : index
    %c0_41 = arith.constant 0 : index
    %37 = vector.load %arg7[%c0_40, %c0_41] : memref<36x324xbf16, #tpu.memory_space<vmem>>, vector<36x324xbf16>
    %cst = arith.constant dense<0.000000e+00> : vector<4x324xf32>
    %38 = tpu.matmul %36, %37, %cst {dimension_numbers = #tpu.dot_dimension_numbers<[1], [0], [0], [1], [0, 0, 1, 1], [], []>} : vector<4x36xbf16>, vector<36x324xbf16>, vector<4x324xf32> -> vector<4x324xf32>
    %cst_42 = arith.constant 0.000000e+00 : f32
    %39 = vector.broadcast %cst_42 : f32 to vector<4x324xf32>
    %40 = arith.cmpf ogt, %38, %39 : vector<4x324xf32>
    %cst_43 = arith.constant 2.000000e-01 : f32
    %41 = vector.broadcast %cst_43 : f32 to vector<4x324xf32>
    %42 = arith.mulf %41, %38 : vector<4x324xf32>
    %43 = arith.select %40, %38, %42 : vector<4x324xi1>, vector<4x324xf32>
    %c0_44 = arith.constant 0 : index
    %c0_45 = arith.constant 0 : index
    %44 = vector.load %arg3[%c0_44, %c0_45] : memref<1x324xf32, #tpu.memory_space<vmem>>, vector<1x324xf32>
    %45 = vector.broadcast %44 : vector<1x324xf32> to vector<4x324xf32>
    %46 = arith.mulf %43, %45 : vector<4x324xf32>
    %47 = arith.truncf %46 : vector<4x324xf32> to vector<4x324xbf16>
    %c0_46 = arith.constant 0 : index
    %c128 = arith.constant 128 : index
    %48 = vector.load %arg8[%c0_46, %c128] : memref<4x460xbf16, #tpu.memory_space<vmem>>, vector<4x324xbf16>
    tpu.vector_store %arg8[%c0_46, %c128], %47 {strides = array<i32>} : memref<4x460xbf16, #tpu.memory_space<vmem>>, vector<4x324xbf16>,
    %cst_47 = arith.constant 0.000000e+00 : bf16
    %49 = vector.broadcast %cst_47 : bf16 to vector<4x1xbf16>
    %c0_48 = arith.constant 0 : index
    %c127 = arith.constant 127 : index
    %50 = vector.load %arg8[%c0_48, %c127] : memref<4x460xbf16, #tpu.memory_space<vmem>>, vector<4x1xbf16>
    tpu.vector_store %arg8[%c0_48, %c127], %49 {strides = array<i32>} : memref<4x460xbf16, #tpu.memory_space<vmem>>, vector<4x1xbf16>,
    %c0_i32 = arith.constant 0 : i32
    %51 = arith.cmpi eq, %arg1, %c0_i32 : i32
    %52 = arith.extui %51 : i1 to i32
    %c0_i32_49 = arith.constant 0 : i32
    %53 = arith.cmpi ne, %52, %c0_i32_49 : i32
    scf.if %53 {
      %cst_94 = arith.constant 0.000000e+00 : bf16
      %84 = vector.broadcast %cst_94 : bf16 to vector<4x18xbf16>
      %c0_95 = arith.constant 0 : index
      %c128_96 = arith.constant 128 : index
      %85 = vector.load %arg8[%c0_95, %c128_96] : memref<4x460xbf16, #tpu.memory_space<vmem>>, vector<4x18xbf16>
      tpu.vector_store %arg8[%c0_95, %c128_96], %84 {strides = array<i32>} : memref<4x460xbf16, #tpu.memory_space<vmem>>, vector<4x18xbf16>,
    } else {
    }
    %c0_i32_50 = arith.constant 0 : i32
    %54 = arith.cmpi eq, %arg1, %c0_i32_50 : i32
    %55 = arith.extui %54 : i1 to i32
    %c0_i32_51 = arith.constant 0 : i32
    %56 = arith.cmpi ne, %55, %c0_i32_51 : i32
    scf.if %56 {
      %cst_94 = arith.constant 0.000000e+00 : bf16
      %84 = vector.broadcast %cst_94 : bf16 to vector<4x18xbf16>
      %c0_95 = arith.constant 0 : index
      %c434 = arith.constant 434 : index
      %85 = vector.load %arg8[%c0_95, %c434] : memref<4x460xbf16, #tpu.memory_space<vmem>>, vector<4x18xbf16>
      tpu.vector_store %arg8[%c0_95, %c434], %84 {strides = array<i32>} : memref<4x460xbf16, #tpu.memory_space<vmem>>, vector<4x18xbf16>,
    } else {
    }
    %c0_52 = arith.constant 0 : index
    %c127_53 = arith.constant 127 : index
    %57 = vector.load %arg8[%c0_52, %c127_53] : memref<4x460xbf16, #tpu.memory_space<vmem>>, vector<4x288xbf16>
    %c0_54 = arith.constant 0 : index
    %c0_55 = arith.constant 0 : index
    %58 = vector.load %arg7[%c0_54, %c0_55] : memref<36x324xbf16, #tpu.memory_space<vmem>>, vector<4x288xbf16>
    tpu.vector_store %arg7[%c0_54, %c0_55], %57 {strides = array<i32>} : memref<36x324xbf16, #tpu.memory_space<vmem>>, vector<4x288xbf16>,
    %c0_56 = arith.constant 0 : index
    %c128_57 = arith.constant 128 : index
    %59 = vector.load %arg8[%c0_56, %c128_57] : memref<4x460xbf16, #tpu.memory_space<vmem>>, vector<4x288xbf16>
    %c4_58 = arith.constant 4 : index
    %c0_59 = arith.constant 0 : index
    %60 = vector.load %arg7[%c4_58, %c0_59] : memref<36x324xbf16, #tpu.memory_space<vmem>>, vector<4x288xbf16>
    tpu.vector_store %arg7[%c4_58, %c0_59], %59 {strides = array<i32>} : memref<36x324xbf16, #tpu.memory_space<vmem>>, vector<4x288xbf16>,
    %c0_60 = arith.constant 0 : index
    %c129 = arith.constant 129 : index
    %61 = vector.load %arg8[%c0_60, %c129] : memref<4x460xbf16, #tpu.memory_space<vmem>>, vector<4x288xbf16>
    %c8_61 = arith.constant 8 : index
    %c0_62 = arith.constant 0 : index
    %62 = vector.load %arg7[%c8_61, %c0_62] : memref<36x324xbf16, #tpu.memory_space<vmem>>, vector<4x288xbf16>
    tpu.vector_store %arg7[%c8_61, %c0_62], %61 {strides = array<i32>} : memref<36x324xbf16, #tpu.memory_space<vmem>>, vector<4x288xbf16>,
    %c0_63 = arith.constant 0 : index
    %c145 = arith.constant 145 : index
    %63 = vector.load %arg8[%c0_63, %c145] : memref<4x460xbf16, #tpu.memory_space<vmem>>, vector<4x288xbf16>
    %c12_64 = arith.constant 12 : index
    %c0_65 = arith.constant 0 : index
    %64 = vector.load %arg7[%c12_64, %c0_65] : memref<36x324xbf16, #tpu.memory_space<vmem>>, vector<4x288xbf16>
    tpu.vector_store %arg7[%c12_64, %c0_65], %63 {strides = array<i32>} : memref<36x324xbf16, #tpu.memory_space<vmem>>, vector<4x288xbf16>,
    %c0_66 = arith.constant 0 : index
    %c146 = arith.constant 146 : index
    %65 = vector.load %arg8[%c0_66, %c146] : memref<4x460xbf16, #tpu.memory_space<vmem>>, vector<4x288xbf16>
    %c16_67 = arith.constant 16 : index
    %c0_68 = arith.constant 0 : index
    %66 = vector.load %arg7[%c16_67, %c0_68] : memref<36x324xbf16, #tpu.memory_space<vmem>>, vector<4x288xbf16>
    tpu.vector_store %arg7[%c16_67, %c0_68], %65 {strides = array<i32>} : memref<36x324xbf16, #tpu.memory_space<vmem>>, vector<4x288xbf16>,
    %c0_69 = arith.constant 0 : index
    %c147 = arith.constant 147 : index
    %67 = vector.load %arg8[%c0_69, %c147] : memref<4x460xbf16, #tpu.memory_space<vmem>>, vector<4x288xbf16>
    %c20_70 = arith.constant 20 : index
    %c0_71 = arith.constant 0 : index
    %68 = vector.load %arg7[%c20_70, %c0_71] : memref<36x324xbf16, #tpu.memory_space<vmem>>, vector<4x288xbf16>
    tpu.vector_store %arg7[%c20_70, %c0_71], %67 {strides = array<i32>} : memref<36x324xbf16, #tpu.memory_space<vmem>>, vector<4x288xbf16>,
    %c0_72 = arith.constant 0 : index
    %c163 = arith.constant 163 : index
    %69 = vector.load %arg8[%c0_72, %c163] : memref<4x460xbf16, #tpu.memory_space<vmem>>, vector<4x288xbf16>
    %c24_73 = arith.constant 24 : index
    %c0_74 = arith.constant 0 : index
    %70 = vector.load %arg7[%c24_73, %c0_74] : memref<36x324xbf16, #tpu.memory_space<vmem>>, vector<4x288xbf16>
    tpu.vector_store %arg7[%c24_73, %c0_74], %69 {strides = array<i32>} : memref<36x324xbf16, #tpu.memory_space<vmem>>, vector<4x288xbf16>,
    %c0_75 = arith.constant 0 : index
    %c164 = arith.constant 164 : index
    %71 = vector.load %arg8[%c0_75, %c164] : memref<4x460xbf16, #tpu.memory_space<vmem>>, vector<4x288xbf16>
    %c28_76 = arith.constant 28 : index
    %c0_77 = arith.constant 0 : index
    %72 = vector.load %arg7[%c28_76, %c0_77] : memref<36x324xbf16, #tpu.memory_space<vmem>>, vector<4x288xbf16>
    tpu.vector_store %arg7[%c28_76, %c0_77], %71 {strides = array<i32>} : memref<36x324xbf16, #tpu.memory_space<vmem>>, vector<4x288xbf16>,
    %c0_78 = arith.constant 0 : index
    %c165 = arith.constant 165 : index
    %73 = vector.load %arg8[%c0_78, %c165] : memref<4x460xbf16, #tpu.memory_space<vmem>>, vector<4x288xbf16>
    %c32_79 = arith.constant 32 : index
    %c0_80 = arith.constant 0 : index
    %74 = vector.load %arg7[%c32_79, %c0_80] : memref<36x324xbf16, #tpu.memory_space<vmem>>, vector<4x288xbf16>
    tpu.vector_store %arg7[%c32_79, %c0_80], %73 {strides = array<i32>} : memref<36x324xbf16, #tpu.memory_space<vmem>>, vector<4x288xbf16>,
    %c0_81 = arith.constant 0 : index
    %c0_82 = arith.constant 0 : index
    %75 = vector.load %arg5[%c0_81, %c0_82] : memref<4x36xbf16, #tpu.memory_space<vmem>>, vector<4x36xbf16>
    %c0_83 = arith.constant 0 : index
    %c0_84 = arith.constant 0 : index
    %76 = vector.load %arg7[%c0_83, %c0_84] : memref<36x324xbf16, #tpu.memory_space<vmem>>, vector<36x288xbf16>
    %cst_85 = arith.constant dense<0.000000e+00> : vector<4x288xf32>
    %77 = tpu.matmul %75, %76, %cst_85 {dimension_numbers = #tpu.dot_dimension_numbers<[1], [0], [0], [1], [0, 0, 1, 1], [], []>} : vector<4x36xbf16>, vector<36x288xbf16>, vector<4x288xf32> -> vector<4x288xf32>
    %c0_86 = arith.constant 0 : index
    %c0_87 = arith.constant 0 : index
    %c0_88 = arith.constant 0 : index
    %c37_89 = arith.constant 37 : index
    %78 = vector.load %arg2[%c0_86, %c0_87, %c0_88, %c37_89] : memref<1x1x4x378xf32, #tpu.memory_space<vmem>>, vector<1x1x4x288xf32>
    %79 = vector.shape_cast %78 : vector<1x1x4x288xf32> to vector<4x288xf32>
    %80 = arith.addf %77, %79 : vector<4x288xf32>
    %c0_90 = arith.constant 0 : index
    %c0_91 = arith.constant 0 : index
    %c0_92 = arith.constant 0 : index
    %c0_93 = arith.constant 0 : index
    %81 = vector.load %arg6[%c0_90, %c0_91, %c0_92, %c0_93] : memref<1x1x4x288xf32, #tpu.memory_space<vmem>>, vector<1x1x4x288xf32>
    %82 = vector.shape_cast %81 : vector<1x1x4x288xf32> to vector<4x288xf32>
    %83 = vector.shape_cast %80 : vector<4x288xf32> to vector<1x1x4x288xf32>
    tpu.vector_store %arg6[%c0_90, %c0_91, %c0_92, %c0_93], %83 {strides = array<i32>} : memref<1x1x4x288xf32, #tpu.memory_space<vmem>>, vector<1x1x4x288xf32>,
    return
  }
  func.func @transform_0(%arg0: i32, %arg1: i32) -> (i32, i32, i32, i32) {
    %c0_i32 = arith.constant 0 : i32
    %c0_i32_0 = arith.constant 0 : i32
    %c0_i32_1 = arith.constant 0 : i32
    return %arg0, %arg1, %c0_i32, %c0_i32_0 : i32, i32, i32, i32
  }
  func.func @transform_1(%arg0: i32, %arg1: i32) -> (i32, i32) {
    %c0_i32 = arith.constant 0 : i32
    %c0_i32_0 = arith.constant 0 : i32
    %c0_i32_1 = arith.constant 0 : i32
    return %c0_i32, %c0_i32_0 : i32, i32
  }
  func.func @transform_2(%arg0: i32, %arg1: i32) -> (i32, i32) {
    %c0_i32 = arith.constant 0 : i32
    %c0_i32_0 = arith.constant 0 : i32
    %c0_i32_1 = arith.constant 0 : i32
    return %c0_i32, %c0_i32_0 : i32, i32
  }
  func.func @transform_3(%arg0: i32, %arg1: i32) -> (i32, i32) {
    %c0_i32 = arith.constant 0 : i32
    %c0_i32_0 = arith.constant 0 : i32
    %c0_i32_1 = arith.constant 0 : i32
    return %c0_i32, %c0_i32_0 : i32, i32
  }
  func.func @transform_4(%arg0: i32, %arg1: i32) -> (i32, i32, i32, i32) {
    %c0_i32 = arith.constant 0 : i32
    %c0_i32_0 = arith.constant 0 : i32
    %c0_i32_1 = arith.constant 0 : i32
    return %arg0, %arg1, %c0_i32, %c0_i32_0 : i32, i32, i32, i32
  }
}

</mosaic_0001>

<bundles_post_ra>
// kernel: tpu_custom_call.1
= control target key start
LH: loop header
LB: loop body
LE: loop exit
PB: predicated region body
PF: predicated region fallthrough
CT: control target
= control target key end

     0   :  { %s1990_s0 = inlined_call_operand.hbm [shape: f32[2,1,4,378], index: 0, kind: input, shape index: {}]   ;;  %s1991_s1 = inlined_call_operand.hbm [shape: f32[1,324], index: 1, kind: input, shape index: {}]   ;;  %s1992_s2 = inlined_call_operand.vmem [shape: bf16[4,36], index: 2, kind: input, shape index: {}]   ;;  %s1993_s3 = inlined_call_operand.vmem [shape: bf16[4,36], index: 3, kind: input, shape index: {}]   ;;  %s1994_s4 = inlined_call_operand.hbm [shape: f32[2,1,4,288], index: 4, kind: output, shape index: {}]  }
   0x1   :  { %1996 = sst [smem:[#allocation13_spill]] %s1991_s1 }
   0x2   :  { %9 = vsyncpa [#allocation5], 0 }
   0x3   :  { %11 = vsyncpa [#allocation5 + $0x1], 0 }
   0x4   :  { %12 = vsyncpa [#allocation8], 0 }
   0x5   :  { %13 = vsyncpa [#allocation6], 0 }
   0x6   :  { %15 = vsyncpa [#allocation6 + $0x1], 0  ;;  %s1668_s15 = smov 0   ;;  %s1670_s16 = smov 0  }
   0x7   :  { %s1672_s17 = smov 0   ;;  %s1674_s18 = smov 0  }
   0x8   :  { %s1676_s19 = smov 0   ;;  %s1678_s20 = smov 0  }
   0x9 LB: > { %s1260_s21 = sadd.s32 4294967295, %s1623_s20   ;;  %s1261_s22 = sadd.s32 4294967294, %s1623_s20   ;;  %s1623_s20 = sphi %s1678_s20, %s21_s20   ;;  %s1619_s19 = sphi %s1676_s19, %s2013_s19   ;;  %s1615_s18 = sphi %s1674_s18, %s2012_s18   ;;  %s1611_s17 = sphi %s1672_s17, %s2011_s17   ;;  %s1607_s16 = sphi %s1670_s16, %s2010_s16   ;;  %s1603_s15 = sphi %s1668_s15, %s2009_s15  }
   0xa   : > { %p55_p0 = scmp.ne.s32.totalorder %s1607_s16, %s1603_s15  ;;  %p1702_p1 = scmp.eq.s32.totalorder %s1260_s21, 0 }
   0xb   : > { %p1706_p2 = scmp.eq.s32.totalorder %s1260_s21, 1  ;;  %p150_p3 = scmp.eq.s32.totalorder %s1261_s22, 1 }
   0xc   : > { %p1712_p4 = por %p1702_p1, %p55_p0  ;;  %p1262_p5 = scmp.ge.s32.totalorder %s1623_s20, 1 }
   0xd   : > { %p1717_p6 = por %p150_p3, %p55_p0  ;;  %p157_p7 = scmp.lt.s32.totalorder %s1623_s20, 3 }
   0xe   : > { %s1999_s25 = scalar_select %p1712_p4, 1, 0 }
   0xf   : > { %s2000_s26 = scalar_select %p1717_p6, 1, 0 }
  0x10   : > { %p1722_p8 = pnand %p1262_p5, %p157_p7  ;;  %s1625_s28 = smov [#allocation7]  }
  0x11   : > { %s170_s29 = sshll.u32 %s1625_s28, 4  ;;  %s33_s5 = sadd.s32 1, %s1619_s19  ;;  %s171_s29 = int_to_ptr.vmem [resolvable:$true] %s170_s29 }
  0x12   : > { %p1373_p10 = pneg %p1722_p8  ;;  %s42_s6 = sadd.s32 1, %s1611_s17 }
  0x13   : > { %p35_p12 = scmp.ge.s32.totalorder %s33_s5, 2  ;;  %s1496_s7 = scalar_lea.vmem %s171_s29, 48 }
  0x14   : > { %p1731_p11 = pnand %p1373_p10, %p1702_p1  ;;  %p1497_p0 = scmp.ne.s32.totalorder %s171_s29, %s1496_s7 }
  0x15   : > { %s1503_s8 = scalar_lea.vmem %s171_s29, 64  ;;  %p1504_p7 = scmp.lt.s32.totalorder %s171_s29, %s171_s29 }
  0x16   : > { %p1487_p13 = pneg %p1731_p11  ;;  %p1505_p9 = scmp.lt.s32.totalorder %s1503_s8, %s1496_s7 }
  0x18   : > { %p1499_p3 = pnand %p1497_p0, %p1487_p13  ;;  %p1506_p6 = por %p1505_p9, %p1504_p7 }
  0x1a   : > { %p1500_p5 = pneg %p1499_p3 }
  0x1c   : > { %p1507_p4 = pnand %p1506_p6, %p1500_p5 }
  0x1e   : > { %1510 = shalt.err (!%p1507_p4)
}
  0x1f   : > { %s2003_s1 = sld [smem:[#allocation13_spill]]  ;;  %s2015_s5 = smov (%p35_p12, %s33_s5), 0 }
  0x20   : > { %p49_p6 = scmp.ne.s32.totalorder %s1611_s17, %s1607_s16  ;;  %p50_p4 = scmp.eq.s32.totalorder %s1623_s20, 0 }
  0x21   : > { %s37_s11 = ssub.s32 %s1619_s19, %s2015_s5  ;;  %p1386_p9 = scmp.lt.s32.totalorder %s1623_s20, 2 }
  0x22   : > { %p40_p10 = scmp.eq.s32.totalorder %s37_s11, 0  ;;  %p51_p13 = por %p50_p4, %p49_p6 }
  0x23   : > { %p1754_p0 = por %p1706_p2, %p49_p6  ;;  %s187_s13 = sand.u32 1, %s1611_s17  }
  0x24   : > { %s1760_s14 = scalar_select %p40_p10, %s1611_s17, %s42_s6  }
  0x25   : > { %1376 = dma.hbm_to_vmem [thread:$0]  (!%p1731_p11), %s2003_s1, 48, %s171_s29, [#allocation8]  }
  0x26   : > { %s1361_s21 = smul.u32 12, %s187_s13  ;;  %p1763_p11 = pnand %p1386_p9, %p51_p13 }
  0x27   : > { %s1362_s22 = smul.u32 192, %s1619_s19  ;;  %s188_s9 = scalar_lea.sflag [#allocation5], %s187_s13 }
  0x28   : > { %s191_s8 = scalar_lea.vmem [#allocation4], %s1361_s21  ;;  %p1513_p2 = pneg %p1763_p11 }
  0x29   : > { %s199_s7 = scalar_lea.hbm %s1990_s0, %s1362_s22  ;;  %s201_s24 = sshll.u32 %s191_s8, 4  ;;  %s202_s24 = int_to_ptr.vmem [resolvable:$true] %s201_s24 }
  0x2a   : > { %s1524_s10 = scalar_lea.vmem %s202_s24, 192  ;;  %s1626_s6 = smov [#allocation4]  }
  0x2b   : > { %p1525_p12 = scmp.ne.s32.totalorder %s202_s24, %s1524_s10  ;;  %s1529_s11 = sshll.u32 %s1626_s6, 4  ;;  %s1530_s11 = int_to_ptr.vmem [resolvable:$false] %s1529_s11 }
  0x2c   : > { %s1531_s1 = scalar_lea.vmem %s1530_s11, 384  ;;  %p1532_p7 = scmp.lt.s32.totalorder %s202_s24, %s1530_s11 }
  0x2d   : > { %p1527_p3 = pnand %p1525_p12, %p1513_p2  ;;  %p1533_p6 = scmp.lt.s32.totalorder %s1531_s1, %s1524_s10 }
  0x2f   : > { %p1528_p5 = pneg %p1527_p3  ;;  %p1534_p4 = por %p1533_p6, %p1532_p7 }
  0x31   : > { %p1535_p9 = pnand %p1534_p4, %p1528_p5 }
  0x33   : > { %1538 = shalt.err (!%p1535_p9)
}
  0x34   : > { %1380 = dma.hbm_to_vmem [thread:$0]  (!%p1763_p11), %s199_s7, 192, %s202_s24, %s188_s9  }
  0x35   : > { %210 = sbr.rel (%p1722_p8) target bundleno = 814 (0x32e), region = 36  ;;  %s1777_s13 = sand.u32 (!%p1722_p8), 1, %s1607_s16  }
  0x36   : > { %s1363_s21 = smul.u32 (!%p1722_p8), 12, %s1777_s13  ;;  %s213_s22 = scalar_lea.sflag (!%p1722_p8), [#allocation5], %s1777_s13 }
  0x37   : > { %p2006_p10 = scmp.ne.s32.totalorder (!%p1722_p8), %s1999_s25, 0 }
  0x38   : > { %s1783_s1 = scalar_lea.vmem (!%p1722_p8), [#allocation4], %s1363_s21 }
  0x3a   : > { %1590 = dma.done.wait (%p2006_p10), %s213_s22, 192  }
  0x3b   : > { %1592 = vsyncadd (%p2006_p10), %s213_s22, 4294967104 }
  0x3c   : > { %1594 = dma.done.wait (%p1702_p1), [#allocation8], 48  }
  0x3d   : > { %1596 = vsyncadd (%p1702_p1), [#allocation8], 4294967248  ;;  %v1627_v0 = vmov 0.0   ;;  %v481_v1 = vld [vmem:[%s1783_s1 + $0x8] sm:$0xf]  ;;  %v1797_v3 = vld [vmem:[%s1783_s1] sm:$0xff] }
  0x3e   : > { %1341 = vmatprep.subr.bf16.mxu1 %v1627_v0  ;;  %v361_v2 = vld [vmem:[%s1783_s1 + $0x8] sm:$0xf]  ;;  %v1332_v4 = vpack.c.bf16 %v481_v1, %v481_v1  ;;  %v1801_v6 = vcombine.high %v1797_v3, %v1797_v3  ;;  %s1628_s23 = smov 90   ;;  %s1629_s25 = smov 109   ;;  %vm265_vm0 = vcmask 549888   ;;  %vm1635_vm1 = vmmov 0  }
  0x3f   : > { %v1324_v5 = vpack.c.bf16 %v361_v2, %v361_v2  ;;  %v421_v7 = vld [vmem:[%s1783_s1 + $0x8] sm:$0xf]  ;;  %s1630_s27 = smov 92   ;;  %s1631_s28 = smov 108   ;;  %1347 = vmatprep.mubr.msk.bf16.mxu1 %vm1635_vm1, %v1627_v0  ;;  %vm712_vm2 = vcmask 1042424   ;;  %v1637_v27 = vmov 0  }
  0x40   : > { %498 = vrot.lane.b32.xlu0 %v1332_v4, %s1628_s23  ;;  %v1331_v8 = vpack.c.bf16 %v1801_v6, %v1797_v3  ;;  %v1328_v9 = vpack.c.bf16 %v421_v7, %v421_v7  ;;  %v247_v10 = vld [vmem:[%s1783_s1 + $0x8] sm:$0xf]  ;;  %s1632_s29 = smov 91   ;;  %s1633_s30 = smov 127   ;;  %606 = vmatprep.mubr.bf16.mxu0 %v1637_v27  ;;  %713 = vst.msk [vmem:[#allocation3] sm:$0x3] %vm712_vm2, %v1637_v27 }
  0x41   : > { %378 = vrot.lane.b32.xlu1 %v1324_v5, %s1629_s25  ;;  %v390_v11 = vld [vmem:[%s1783_s1 + $0x8] sm:$0xf]  ;;  %v1316_v12 = vpack.c.bf16 %v247_v10, %v247_v10  ;;  %s1634_s7 = smov 126   ;;  %s1636_s8 = smov 110   ;;  %vm291_vm3 = vcmask 1043456   ;;  %vm503_vm4 = vcmask 736256  }
  0x42   : > { %264 = vst [vmem:[#allocation2] sm:$0x33] %v1331_v8  ;;  %v1326_v13 = vpack.c.bf16 %v390_v11, %v390_v11  ;;  %v450_v14 = vld [vmem:[%s1783_s1 + $0x8] sm:$0xf]  ;;  %v405_v15 = vrot.slane %v1331_v8, 6  ;;  %vm443_vm5 = vcmask 752640  }
  0x43   : > { %266 = vst.msk [vmem:[#allocation2 + $0x8] sm:$0x3] %vm265_vm0, %v1316_v12  ;;  %v1330_v17 = vpack.c.bf16 %v450_v14, %v450_v14  ;;  %v268_v18 = vld [vmem:[%s1783_s1 + $0x8] sm:$0xf]  ;;  %vm564_vm6 = vcmask 1041408   ;;  %vm383_vm7 = vcmask 891904  }
  0x44   : > { %496 = vrot.lane.b32.xlu0 %v1331_v8, %s1628_s23  ;;  %v406_v16 = vrot.slane %v1326_v13, 6  ;;  %v1318_v20 = vpack.c.bf16 %v268_v18, %v268_v18  ;;  %v301_v22 = vld [vmem:[%s1783_s1 + $0x8] sm:$0xf]  ;;  %vm298_vm8 = vcmask 551938   ;;  %vm414_vm9 = vcmask 883712   ;;  %s1639_s10 = smov 93  }
  0x45   : > { %438 = vrot.lane.b32.xlu1 %v1328_v9, %s1630_s27  ;;  %v466_v19 = vrot.slane %v1330_v17, 6  ;;  %v330_v23 = vld [vmem:[%s1783_s1 + $0x8] sm:$0xf]  ;;  %v1320_v24 = vpack.c.bf16 %v301_v22, %v301_v22  ;;  %vm474_vm10 = vcmask 744448   ;;  %vm293_vm11 = vcmask 1039360   ;;  %s1640_s6 = smov 1  }
  0x46   : > { %v284_v21 = vrot.slane %v1318_v20, 6  ;;  %v1322_v25 = vpack.c.bf16 %v330_v23, %v330_v23  ;;  %vm323_vm12 = vcmask 1031168   ;;  %vm354_vm13 = vcmask 900096   ;;  %s1641_s11 = smov 111   ;;  %s244_s23 = scalar_lea.vmem [#allocation9], %s1363_s21 }
  0x47   : > { %vm560_vm14 = vcmask 293888   ;;  %vm707_vm2 = vcmask 1043458  }
  0x48   : > { %436 = vrot.lane.b32.xlu0 %v1331_v8, %s1630_s27  ;;  %v346_v26 = vrot.slane %v1322_v25, 6  ;;  %v509_v25 = vld [vmem:[%s1992_s2] sm:$0x3] }
  0x49   : > { %376 = vrot.lane.b32.xlu1 %v1331_v8, %s1629_s25 }
  0x4c   : > { %407 = vrot.lane.b32.xlu0 %v405_v15, %s1631_s28 }
  0x4d   : > { %409 = vrot.lane.b32.xlu1 %v406_v16, %s1631_s28 }
  0x50   : > { %467 = vrot.lane.b32.xlu0 %v405_v15, %s1632_s29 }
  0x51   : > { %469 = vrot.lane.b32.xlu1 %v466_v19, %s1632_s29 }
  0x54   : > { %285 = vrot.lane.b32.xlu0 %v405_v15, %s1633_s30 }
  0x55   : > { %287 = vrot.lane.b32.xlu1 %v284_v21, %s1633_s30 }
  0x58   : > { %316 = vrot.lane.b32.xlu0 %v1331_v8, %s1634_s7 }
  0x59   : > { %318 = vrot.lane.b32.xlu1 %v1320_v24, %s1634_s7  ;;  %s1642_s7 = smov [#allocation9]  }
  0x5c   : > { %347 = vrot.lane.b32.xlu0 %v405_v15, %s1636_s8 }
  0x5d   : > { %349 = vrot.lane.b32.xlu1 %v346_v26, %s1636_s8 }
  0xb2   : > { %v499_v28 = vpop.permute.xlu0 %498 }
  0xb3   : > { %v379_v29 = vpop.permute.xlu1 %378  ;;  %508 = vst.msk [vmem:[#allocation2 + $0x38] sm:$0x3] %vm265_vm0, %v499_v28  ;;  %v501_v32 = vrot.slane %v499_v28, 4 }
  0xb4   : > { %388 = vst.msk [vmem:[#allocation2 + $0x20] sm:$0x3] %vm265_vm0, %v379_v29  ;;  %v381_v39 = vrot.slane %v379_v29, 4  ;;  %v666_v29 = vlaneseq }
  0xb6   : > { %v497_v30 = vpop.permute.xlu0 %496 }
  0xb7   : > { %v439_v31 = vpop.permute.xlu1 %438  ;;  %v500_v33 = vrot.slane %v497_v30, 4 }
  0xb8   : > { %448 = vst.msk [vmem:[#allocation2 + $0x2c] sm:$0x3] %vm265_vm0, %v439_v31  ;;  %v441_v40 = vrot.slane %v439_v31, 4 }
  0xb9   : > { %v502_v34 = vsel %vm291_vm3, %v500_v33, %v501_v32  ;;  %v664_v33 = vld [vmem:[#allocation7] sm:$0x7] }
  0xba   : > { %v504_v35 = vsel %vm503_vm4, %v497_v30, %v502_v34  ;;  %v437_v36 = vpop.permute.xlu0 %436  ;;  %v1454_v38 = vld [vmem:[#allocation2 + $0x38] ss:$0 sps:$4 sm:$0x33]   ;;  %v667_v30 = vshrl.u32 %v666_v29, 7  ;;  %vm708_vm4 = vmor %vm707_vm2, %vm564_vm6  ;;  %vm917_vm2 = vcmask 760832  }
  0xbb   : > { %v377_v37 = vpop.permute.xlu1 %376  ;;  %507 = vst [vmem:[#allocation2 + $0x30] sm:$0x33] %v504_v35  ;;  %v440_v41 = vrot.slane %v437_v36, 4  ;;  %v572_v43 = vsel %vm564_vm6, %v1454_v38, 0 }
  0xbc   : > { %v380_v42 = vrot.slane %v377_v37, 4  ;;  %1342 = vmatpush3.bf16.msra.mxu1 %v572_v43  ;;  %v676_v31 = vsub.s32 2, %v667_v30 }
  0xbd   : > { %v442_v44 = vsel %vm291_vm3, %v440_v41, %v441_v40  ;;  %1343 = vmatprep.subr.bf16.mxu1 %v1627_v0  ;;  %v672_v40 = vsub.s32 1, %v667_v30 }
  0xbe   : > { %v382_v45 = vsel %vm291_vm3, %v380_v42, %v381_v39  ;;  %v444_v46 = vsel %vm443_vm5, %v437_v36, %v442_v44  ;;  %v408_v48 = vpop.permute.xlu0 %407  ;;  %v677_v36 = vrot.slane %v664_v33, %v676_v31  ;;  %v668_v39 = vsub.s32 0, %v667_v30 }
  0xbf   : > { %v384_v47 = vsel %vm383_vm7, %v377_v37, %v382_v45  ;;  %v410_v49 = vpop.permute.xlu1 %409  ;;  %447 = vst [vmem:[#allocation2 + $0x24] sm:$0x33] %v444_v46  ;;  %v411_v50 = vrot.slane %v408_v48, 4  ;;  %v1638_v37 = vmov 1983009808  }
  0xc0   : > { %387 = vst [vmem:[#allocation2 + $0x18] sm:$0x33] %v384_v47  ;;  %v412_v51 = vrot.slane %v410_v49, 4  ;;  %419 = vst.msk [vmem:[#allocation2 + $0x20] sm:$0xc] %vm298_vm8, %v410_v49  ;;  %v692_v38 = vunpack.c.l.s4 %v1638_v37 }
  0xc2   : > { %v413_v52 = vsel %vm291_vm3, %v411_v50, %v412_v51  ;;  %v468_v54 = vpop.permute.xlu0 %467  ;;  %v518_v56 = vld [vmem:[#allocation2 + $0x30] sm:$0x33]  ;;  %v693_v47 = vunpack.c.0.s8 %v692_v38  ;;  %v673_v50 = vrot.slane %v664_v33, %v672_v40  ;;  %v993_v38 = vld [vmem:[%s1783_s1 + $0x8] sm:$0xf] }
  0xc3   : > { %v415_v53 = vsel %vm414_vm9, %v408_v48, %v413_v52  ;;  %v470_v55 = vpop.permute.xlu1 %469  ;;  %v471_v57 = vrot.slane %v468_v54, 4  ;;  %v1293_v59 = vcombine.high %v518_v56, %v518_v56  ;;  %v1292_v60 = vcombine.low %v518_v56, %v518_v56 }
  0xc4   : > { %418 = vst [vmem:[#allocation2 + $0x18] sm:$0xcc] %v415_v53  ;;  %v472_v58 = vrot.slane %v470_v55, 4  ;;  %479 = vst.msk [vmem:[#allocation2 + $0x2c] sm:$0xc] %vm298_vm8, %v470_v55  ;;  %v669_v48 = vrot.slane %v664_v33, %v668_v39  ;;  %v1862_v56 = vsub.s32 %v693_v47, %v667_v30 }
  0xc5   : > { %1295 = vmatprep.subr.msk.bf16.mxu0 %vm564_vm6, %v1293_v59  ;;  %v566_v62 = vsel %vm564_vm6, %v1292_v60, 0 }
  0xc6   : > { %v473_v61 = vsel %vm291_vm3, %v471_v57, %v472_v58  ;;  %585 = vmatpush1.bf16.msra.mxu0 %v566_v62  ;;  %v286_v2 = vpop.permute.xlu0 %285 }
  0xc7   : > { %v475_v63 = vsel %vm474_vm10, %v468_v54, %v473_v61  ;;  %v288_v1 = vpop.permute.xlu1 %287  ;;  %v289_v5 = vrot.slane %v286_v2, 4 }
  0xc8   : > { %478 = vst [vmem:[#allocation2 + $0x24] sm:$0xcc] %v475_v63  ;;  %v290_v4 = vrot.slane %v288_v1, 4  ;;  %299 = vst.msk [vmem:[#allocation2 + $0x8] sm:$0xc] %vm298_vm8, %v288_v1 }
  0xca   : > { %v292_v7 = vsel %vm291_vm3, %v289_v5, %v290_v4  ;;  %v317_v10 = vpop.permute.xlu0 %316 }
  0xcb   : > { %v294_v8 = vsel %vm293_vm11, %v286_v2, %v292_v7  ;;  %v319_v9 = vpop.permute.xlu1 %318  ;;  %v1457_v11 = vld [vmem:[#allocation2 + $0x20] ss:$12 sps:$4 sm:$0xff]   ;;  %v320_v13 = vrot.slane %v317_v10, 4 }
  0xcc   : > { %297 = vst [vmem:[#allocation2] sm:$0xcc] %v294_v8  ;;  %v321_v12 = vrot.slane %v319_v9, 4  ;;  %328 = vst.msk [vmem:[#allocation2 + $0x14] sm:$0x3] %vm265_vm0, %v319_v9  ;;  %1344 = vmatpush3.bf16.msra.mxu1 %v1457_v11 }
  0xcd   : > { %1345 = vmatprep.subr.bf16.mxu1 %v1627_v0 }
  0xce   : > { %v322_v14 = vsel %vm291_vm3, %v320_v13, %v321_v12  ;;  %v348_v17 = vpop.permute.xlu0 %347 }
  0xcf   : > { %v324_v15 = vsel %vm323_vm12, %v317_v10, %v322_v14  ;;  %v350_v16 = vpop.permute.xlu1 %349  ;;  %v1458_v18 = vld [vmem:[#allocation2 + $0x1c] ss:$12 sps:$4 sm:$0xff]   ;;  %v1460_v19 = vld [vmem:[#allocation2 + $0x18] ss:$12 sps:$4 sm:$0xff]   ;;  %v351_v21 = vrot.slane %v348_v17, 4  ;;  %vm718_vm12 = vcmask 140288  }
  0xd0   : > { %327 = vst [vmem:[#allocation2 + $0xc] sm:$0x33] %v324_v15  ;;  %v352_v20 = vrot.slane %v350_v16, 4  ;;  %359 = vst.msk [vmem:[#allocation2 + $0x14] sm:$0xc] %vm298_vm8, %v350_v16  ;;  %586 = vmatprep.subr.bf16.mxu0 %v1458_v18  ;;  %vm709_vm8 = vcmask 553988  }
  0xd1   : > { %587 = vmatpush1.bf16.msra.mxu0 %v1460_v19  ;;  %vm710_vm9 = vmor %vm709_vm8, %vm708_vm4  ;;  %vm746_vm4 = vcmask 7168  }
  0xd2   : > { %v353_v22 = vsel %vm291_vm3, %v351_v21, %v352_v20 }
  0xd3   : > { %v355_v23 = vsel %vm354_vm13, %v348_v17, %v353_v22 }
  0xd4   : > { %358 = vst [vmem:[#allocation2 + $0xc] sm:$0xcc] %v355_v23 }
  0xd7   : > { %v1461_v24 = vld [vmem:[#allocation2 + $0x8] ss:$12 sps:$4 sm:$0xff]  }
  0xd8   : > { %1346 = vmatpush3.bf16.msra.mxu1 %v1461_v24 }
  0xd9   : > { %1351 = vmatprep.subr.bf16.mxu1 %v1627_v0 }
  0xdb   : > { %v1462_v26 = vld [vmem:[#allocation2 + $0x4] ss:$12 sps:$4 sm:$0xff]   ;;  %v1464_v28 = vld [vmem:[#allocation2] ss:$12 sps:$4 sm:$0xff]   ;;  %1348 = vmatmul.mubr.msk.bf16.vlgmr.msra.gmra.mxu1 %vm560_vm14, %v509_v25 }
  0xdc   : > { %588 = vmatprep.subr.bf16.mxu0 %v1462_v26  ;;  %1357 = vmatprep.mubr.msk.bf16.mxu1 %vm1635_vm1, %v1627_v0 }
  0xdd   : > { %589 = vmatpush1.bf16.msra.mxu0 %v1464_v28 }
  0xe0   : > { %1296 = vmatmul.mubr.msk.bf16.vlgmr.msra.gmra.mxu0 %vm560_vm14, %v509_v25 }
  0xe1   : > { %1093 = vmatprep.mubr.bf16.mxu0 %v1637_v27 }
 0x19b   : > { %v649_v32 = vpop.f32.mrf.mxu1 }
 0x19c   : > { %vm657_vm15 = vcmp.gt.f32.partialorder %v649_v32, 0.0  ;;  %v660_v34 = vmul.f32 0.2, %v649_v32 }
 0x19d   : > { %v1349_v35 = vpop.f32.mrf.mxu1 }
 0x19e   : > { %v663_v41 = vsel %vm657_vm15, %v649_v32, %v660_v34  ;;  %vm720_vm15 = vcmask 550288  }
 0x19f   : > { %v652_v42 = vpop.f32.mrf.mxu1  ;;  %v683_v46 = vmul.f32 %v677_v36, %v663_v41 }
 0x1a0   : > { %v608_v43 = vpop.f32.mrf.mxu0 }
 0x1a1   : > { %vm655_vm0 = vcmp.gt.f32.partialorder %v608_v43, 0.0  ;;  %v658_v44 = vmul.f32 0.2, %v608_v43  ;;  %v1350_v45 = vpop.f32.mrf.mxu1  ;;  %v686_v55 = vpack.c.bf16 %v683_v46, %v683_v46 }
 0x1a2   : > { %v610_v49 = vpop.f32.mrf.mxu0 }
 0x1a3   : > { %v661_v51 = vsel %vm655_vm0, %v608_v43, %v658_v44  ;;  %vm656_vm1 = vcmp.gt.f32.partialorder %v610_v49, 0.0  ;;  %v659_v52 = vmul.f32 0.2, %v610_v49  ;;  %v704_v61 = vrot.slane %v686_v55, %v1862_v56 }
 0x1a4   : > { %v612_v53 = vpop.f32.mrf.mxu0  ;;  %v681_v57 = vmul.f32 %v669_v48, %v661_v51  ;;  %vm774_vm0 = vcmask 257026  }
 0x1a5   : > { %v662_v54 = vsel %vm656_vm1, %v610_v49, %v659_v52  ;;  %vm752_vm1 = vcmask 254976  }
 0x1a6   : > { %v682_v58 = vmul.f32 %v673_v50, %v662_v54  ;;  %v613_v59 = vpop.f32.mrf.mxu0 }
 0x1a8   : > { %v1298_v60 = vpack.c.bf16 %v682_v58, %v681_v57 }
 0x1aa   : > { %v697_v62 = vrot.slane %v1298_v60, %v1862_v56 }
 0x1ac   : > { %v705_v63 = vcombine.low %v697_v62, %v704_v61 }
 0x1ae   : > { %711 = vst.msk [vmem:[#allocation3 + $0x2] sm:$0x3f] %vm710_vm9, %v705_v63 }
 0x1af   : > { %719 = vst.msk [vmem:[#allocation3 + $0x2] sm:$0x3] %vm718_vm12, %v1637_v27 }
 0x1b0   : > { %721 = vst.msk [vmem:[#allocation3 + $0x6] sm:$0x3] %vm720_vm15, %v1637_v27 }
 0x1b7   : > { %v952_v1 = vld [vmem:[#allocation3 + $0x2] sm:$0x3f] }
 0x1b8   : > { %v864_v2 = vld [vmem:[#allocation3 + $0x2] sm:$0x3f]  ;;  %v961_v4 = vrot.slane %v952_v1, %v1862_v56  ;;  %v954_v12 = vcombine.high %v952_v1, %v952_v1 }
 0x1b9   : > { %v880_v5 = vrot.slane %v864_v2, %v1862_v56  ;;  %v923_v7 = vld [vmem:[#allocation3 + $0x2] sm:$0x3f]  ;;  %v866_v25 = vcombine.low %v864_v2, %v864_v2 }
 0x1ba   : > { %v835_v8 = vld [vmem:[#allocation3 + $0x2] sm:$0x3f]  ;;  %969 = vrot.lane.b32.xlu0 %v961_v4, %s1632_s29  ;;  %v939_v10 = vrot.slane %v923_v7, %v1862_v56  ;;  %v968_v15 = vrot.slane %v954_v12, %v1862_v56  ;;  %v925_v30 = vcombine.low %v923_v7, %v923_v7 }
 0x1bb   : > { %883 = vrot.lane.b32.xlu1 %v880_v5, %s1629_s25  ;;  %v754_v9 = vld [vmem:[#allocation3 + $0x2] sm:$0x3f]  ;;  %v844_v11 = vrot.slane %v835_v8, %v1862_v56  ;;  %v837_v17 = vcombine.high %v835_v8, %v835_v8  ;;  %v873_v28 = vrot.slane %v866_v25, %v1862_v56 }
 0x1bc   : > { %v893_v13 = vld [vmem:[#allocation3 + $0x2] sm:$0x3f]  ;;  %v756_v27 = vcombine.low %v754_v9, %v754_v9  ;;  %v770_v14 = vrot.slane %v754_v9, %v1862_v56  ;;  %v932_v33 = vrot.slane %v925_v30, %v1862_v56 }
 0x1bd   : > { %v902_v16 = vrot.slane %v893_v13, %v1862_v56  ;;  %v722_v18 = vld [vmem:[#allocation3] sm:$0xff]  ;;  %v851_v19 = vrot.slane %v837_v17, %v1862_v56  ;;  %v895_v21 = vcombine.high %v893_v13, %v893_v13 }
 0x1be   : > { %852 = vrot.lane.b32.xlu0 %v844_v11, %s1636_s8  ;;  %1299 = vst.sshfl [vmem:[#allocation2] sm:$0xf0 pattern:$0x76325410] %v756_v27  ;;  %775 = vst.msk [vmem:[#allocation2 + $0x8] sm:$0xc] %vm774_vm0, %v770_v14  ;;  %v731_v20 = vrot.slane %v722_v18, %v1862_v56  ;;  %v724_v26 = vcombine.high %v722_v18, %v722_v18 }
 0x1bf   : > { %942 = vrot.lane.b32.xlu1 %v939_v10, %s1630_s27  ;;  %v776_v22 = vld [vmem:[#allocation3 + $0x2] sm:$0x3f]  ;;  %v909_v23 = vrot.slane %v895_v21, %v1862_v56 }
 0x1c0   : > { %v785_v24 = vrot.slane %v776_v22, %v1862_v56  ;;  %v738_v29 = vrot.slane %v724_v26, %v1862_v56  ;;  %v778_v31 = vcombine.high %v776_v22, %v776_v22  ;;  %v805_v32 = vld [vmem:[#allocation3 + $0x2] sm:$0x3f] }
 0x1c1   : > { %v807_v35 = vcombine.low %v805_v32, %v805_v32  ;;  %v821_v37 = vrot.slane %v805_v32, %v1862_v56 }
 0x1c2   : > { %910 = vrot.lane.b32.xlu0 %v902_v16, %s1639_s10  ;;  %v792_v34 = vrot.slane %v778_v31, %v1862_v56 }
 0x1c3   : > { %971 = vrot.lane.b32.xlu1 %v968_v15, %s1632_s29  ;;  %v814_v36 = vrot.slane %v807_v35, %v1862_v56 }
 0x1c6   : > { %739 = vrot.lane.b32.xlu0 %v731_v20, %s1640_s6 }
 0x1c7   : > { %854 = vrot.lane.b32.xlu1 %v851_v19, %s1636_s8  ;;  %s1543_s8 = sshll.u32 %s1642_s7, 4  ;;  %s1544_s8 = int_to_ptr.vmem [resolvable:$false] %s1543_s8 }
 0x1c8   : > { %s1545_s24 = scalar_lea.vmem %s1544_s8, 384 }
 0x1ca   : > { %793 = vrot.lane.b32.xlu0 %v785_v24, %s1633_s30 }
 0x1cb   : > { %912 = vrot.lane.b32.xlu1 %v909_v23, %s1639_s10 }
 0x1ce   : > { %881 = vrot.lane.b32.xlu0 %v873_v28, %s1629_s25  ;;  %s1364_s25 = smul.u32 192, %s1615_s18 }
 0x1cf   : > { %741 = vrot.lane.b32.xlu1 %v738_v29, %s1640_s6 }
 0x1d0   : > { %s1948_s21 = scalar_lea.hbm %s1994_s4, %s1364_s25 }
 0x1d2   : > { %940 = vrot.lane.b32.xlu0 %v932_v33, %s1630_s27  ;;  %s1166_s27 = sshll.u32 %s244_s23, 4  ;;  %s1167_s27 = int_to_ptr.vmem [resolvable:$true] %s1166_s27 }
 0x1d3   : > { %795 = vrot.lane.b32.xlu1 %v792_v34, %s1633_s30  ;;  %v981_v34 = vld [vmem:[%s1993_s3] sm:$0x3]  ;;  %s1150_s30 = scalar_lea.sflag [#allocation6], %s1777_s13  ;;  %s1539_s18 = scalar_lea.vmem %s1167_s27, 192 }
 0x1d4   : > { %p1540_p1 = scmp.ne.s32.totalorder %s1167_s27, %s1539_s18  ;;  %p1546_p11 = scmp.lt.s32.totalorder %s1167_s27, %s1544_s8 }
 0x1d5   : > { %p1547_p2 = scmp.lt.s32.totalorder %s1545_s24, %s1539_s18 }
 0x1d6   : > { %822 = vrot.lane.b32.xlu0 %v814_v36, %s1641_s11  ;;  %p1541_p8 = pnand %p1540_p1, %p1754_p0 }
 0x1d7   : > { %824 = vrot.lane.b32.xlu1 %v821_v37, %s1641_s11  ;;  %p1548_p12 = por %p1547_p2, %p1546_p11 }
 0x1d8   : > { %p1542_p13 = pneg %p1541_p8 }
 0x1da   : > { %1037 = vrot.lane.b32.xlu0 %v1797_v3, %s1632_s29  ;;  %p1549_p3 = pnand %p1548_p12, %p1542_p13 }
 0x1db   : > { %1039 = vrot.lane.b32.xlu1 %v1801_v6, %s1632_s29 }
 0x1de   : > { %1041 = vrot.lane.b32.xlu0 %v993_v38, %s1632_s29 }
 0x22c   : > { %v970_v39 = vpop.permute.xlu0 %969 }
 0x22d   : > { %v884_v40 = vpop.permute.xlu1 %883  ;;  %v973_v3 = vrot.slane %v970_v39, 4 }
 0x22e   : > { %892 = vst.msk [vmem:[#allocation2 + $0x20] sm:$0xc] %vm774_vm0, %v884_v40  ;;  %v886_v60 = vrot.slane %v884_v40, 4 }
 0x230   : > { %v853_v42 = vpop.permute.xlu0 %852 }
 0x231   : > { %v1904_v41 = vpop.permute.xlu1 %942  ;;  %v856_v49 = vrot.slane %v853_v42, 4 }
 0x232   : > { %951 = vst.msk [vmem:[#allocation2 + $0x2c] sm:$0xc] %vm774_vm0, %v1904_v41  ;;  %v945_v17 = vrot.slane %v1904_v41, 4 }
 0x234   : > { %v911_v44 = vpop.permute.xlu0 %910 }
 0x235   : > { %v972_v43 = vpop.permute.xlu1 %971  ;;  %v914_v56 = vrot.slane %v911_v44, 4 }
 0x236   : > { %v974_v45 = vrot.slane %v972_v43, 4  ;;  %980 = vst.msk [vmem:[#allocation2 + $0x38] sm:$0x3] %vm752_vm1, %v972_v43 }
 0x238   : > { %v975_v6 = vsel %vm291_vm3, %v973_v3, %v974_v45  ;;  %v740_v48 = vpop.permute.xlu0 %739 }
 0x239   : > { %v976_v46 = vsel %vm474_vm10, %v970_v39, %v975_v6  ;;  %v855_v47 = vpop.permute.xlu1 %854  ;;  %v743_v61 = vrot.slane %v740_v48, 4 }
 0x23a   : > { %979 = vst [vmem:[#allocation2 + $0x30] sm:$0x33] %v976_v46  ;;  %v857_v50 = vrot.slane %v855_v47, 4  ;;  %863 = vst.msk [vmem:[#allocation2 + $0x20] sm:$0x3] %vm752_vm1, %v855_v47 }
 0x23c   : > { %v858_v51 = vsel %vm291_vm3, %v856_v49, %v857_v50  ;;  %v794_v54 = vpop.permute.xlu0 %793 }
 0x23d   : > { %v859_v52 = vsel %vm354_vm13, %v853_v42, %v858_v51  ;;  %v913_v53 = vpop.permute.xlu1 %912  ;;  %v1474_v55 = vld [vmem:[#allocation2 + $0x38] ss:$0 sps:$4 sm:$0x33]   ;;  %v797_v18 = vrot.slane %v794_v54, 4 }
 0x23e   : > { %862 = vst [vmem:[#allocation2 + $0x18] sm:$0x33] %v859_v52  ;;  %v915_v57 = vrot.slane %v913_v53, 4  ;;  %922 = vst.msk [vmem:[#allocation2 + $0x2c] sm:$0x3] %vm752_vm1, %v913_v53  ;;  %v1059_v58 = vsel %vm564_vm6, %v1474_v55, 0 }
 0x23f   : > { %1352 = vmatpush3.bf16.msra.mxu1 %v1059_v58 }
 0x240   : > { %v916_v59 = vsel %vm291_vm3, %v914_v56, %v915_v57  ;;  %v882_v63 = vpop.permute.xlu0 %881  ;;  %1353 = vmatprep.subr.bf16.mxu1 %v1627_v0 }
 0x241   : > { %v918_v62 = vsel %vm917_vm2, %v911_v44, %v916_v59  ;;  %v742_v1 = vpop.permute.xlu1 %741  ;;  %v990_v2 = vld [vmem:[#allocation2 + $0x30] sm:$0x33]  ;;  %v885_v4 = vrot.slane %v882_v63, 4 }
 0x242   : > { %921 = vst [vmem:[#allocation2 + $0x24] sm:$0x33] %v918_v62  ;;  %v744_v5 = vrot.slane %v742_v1, 4  ;;  %v1307_v7 = vcombine.high %v990_v2, %v990_v2  ;;  %v1306_v8 = vcombine.low %v990_v2, %v990_v2 }
 0x243   : > { %v887_v9 = vsel %vm291_vm3, %v885_v4, %v886_v60 }
 0x244   : > { %v745_v10 = vsel %vm291_vm3, %v743_v61, %v744_v5  ;;  %v748_v11 = vsel %vm746_vm4, %v742_v1, %v744_v5  ;;  %1309 = vmatprep.subr.msk.bf16.mxu0 %vm564_vm6, %v1307_v7  ;;  %v1053_v12 = vsel %vm564_vm6, %v1306_v8, 0  ;;  %v888_v13 = vsel %vm383_vm7, %v882_v63, %v887_v9  ;;  %v941_v14 = vpop.permute.xlu0 %940 }
 0x245   : > { %v747_v27 = vsel %vm746_vm4, %v740_v48, %v745_v10  ;;  %753 = vst.msk [vmem:[#allocation2 + $0x8] sm:$0x3] %vm752_vm1, %v748_v11  ;;  %1072 = vmatpush1.bf16.msra.mxu0 %v1053_v12  ;;  %v796_v15 = vpop.permute.xlu1 %795  ;;  %v1477_v16 = vld [vmem:[#allocation2 + $0x20] ss:$12 sps:$4 sm:$0xff]   ;;  %891 = vst [vmem:[#allocation2 + $0x18] sm:$0xcc] %v888_v13 }
 0x246   : > { %751 = vst [vmem:[#allocation2] sm:$0x33] %v747_v27  ;;  %v944_v19 = vrot.slane %v941_v14, 4  ;;  %v798_v20 = vrot.slane %v796_v15, 4  ;;  %804 = vst.msk [vmem:[#allocation2 + $0x14] sm:$0x3] %vm752_vm1, %v796_v15  ;;  %1354 = vmatpush3.bf16.msra.mxu1 %v1477_v16 }
 0x247   : > { %1355 = vmatprep.subr.bf16.mxu1 %v1627_v0  ;;  %vm829_vm6 = vcmask 908288  }
 0x248   : > { %v946_v21 = vsel %vm291_vm3, %v944_v19, %v945_v17  ;;  %v799_v22 = vsel %vm291_vm3, %v797_v18, %v798_v20  ;;  %v823_v25 = vpop.permute.xlu0 %822 }
 0x249   : > { %v947_v23 = vsel %vm443_vm5, %v941_v14, %v946_v21  ;;  %v800_v24 = vsel %vm293_vm11, %v794_v54, %v799_v22  ;;  %v825_v26 = vpop.permute.xlu1 %824  ;;  %v826_v28 = vrot.slane %v823_v25, 4 }
 0x24a   : > { %950 = vst [vmem:[#allocation2 + $0x24] sm:$0xcc] %v947_v23  ;;  %803 = vst [vmem:[#allocation2 + $0xc] sm:$0x33] %v800_v24  ;;  %v827_v29 = vrot.slane %v825_v26, 4 }
 0x24b   : > { %834 = vst.msk [vmem:[#allocation2 + $0x14] sm:$0xc] %vm774_vm0, %v825_v26 }
 0x24c   : > { %v828_v30 = vsel %vm291_vm3, %v826_v28, %v827_v29  ;;  %v1038_v37 = vpop.permute.xlu0 %1037  ;;  %vm1147_vm3 = vcmask 257024  }
 0x24d   : > { %v830_v31 = vsel %vm829_vm6, %v823_v25, %v828_v30  ;;  %v1040_v42 = vpop.permute.xlu1 %1039 }
 0x24e   : > { %833 = vst [vmem:[#allocation2 + $0xc] sm:$0xcc] %v830_v31  ;;  %v1044_v45 = vsel %vm474_vm10, %v1038_v37, %v1040_v42 }
 0x250   : > { %v1042_v38 = vpop.permute.xlu0 %1041 }
 0x251   : > { %v1478_v32 = vld [vmem:[#allocation2 + $0x18] ss:$12 sps:$4 sm:$0xff]   ;;  %v1480_v33 = vld [vmem:[#allocation2 + $0x1c] ss:$12 sps:$4 sm:$0xff]   ;;  %v1045_v3 = vsel %vm474_vm10, %v1040_v42, %v1042_v38 }
 0x252   : > { %v1481_v0 = vld [vmem:[#allocation2 + $0x8] ss:$12 sps:$4 sm:$0xff]   ;;  %1073 = vmatprep.subr.bf16.mxu0 %v1480_v33 }
 0x253   : > { %1356 = vmatpush3.bf16.msra.mxu1 %v1481_v0  ;;  %1074 = vmatpush1.bf16.msra.mxu0 %v1478_v32 }
 0x255   : > { %v1482_v35 = vld [vmem:[#allocation2] ss:$12 sps:$4 sm:$0xff]   ;;  %v1484_v36 = vld [vmem:[#allocation2 + $0x4] ss:$12 sps:$4 sm:$0xff]  }
 0x256   : > { %1075 = vmatprep.subr.bf16.mxu0 %v1484_v36  ;;  %1358 = vmatmul.mubr.msk.bf16.vlgmr.msra.gmra.mxu1 %vm560_vm14, %v981_v34 }
 0x257   : > { %1076 = vmatpush1.bf16.msra.mxu0 %v1482_v35 }
 0x25a   : > { %1310 = vmatmul.mubr.msk.bf16.vlgmr.msra.gmra.mxu0 %vm560_vm14, %v981_v34 }
 0x316   : > { %v1136_v39 = vpop.f32.mrf.mxu1 }
 0x317   : > { %v1137_v40 = vadd.f32 %v1136_v39, %v1042_v38 }
 0x318   : > { %v1359_v41 = vpop.f32.mrf.mxu1 }
 0x319   : > { %1148 = vst.msk [vmem:[%s244_s23 + $0x8] sm:$0xf] %vm1147_vm3, %v1137_v40 }
 0x31a   : > { %v1095_v43 = vpop.f32.mrf.mxu0  ;;  %v1139_v44 = vpop.f32.mrf.mxu1 }
 0x31b   : > { %v1096_v47 = vadd.f32 %v1095_v43, %v1044_v45 }
 0x31c   : > { %v1097_v6 = vpop.f32.mrf.mxu0  ;;  %v1360_v46 = vpop.f32.mrf.mxu1 }
 0x31d   : > { %v1098_v48 = vadd.f32 %v1097_v6, %v1045_v3 }
 0x31e   : > { %v1099_v49 = vpop.f32.mrf.mxu0 }
 0x31f   : > { %v1144_v50 = vcombine.low %v1096_v47, %v1098_v48 }
 0x320   : > { %v1100_v51 = vpop.f32.mrf.mxu0 }
 0x321   : > { %1146 = vst [vmem:[%s244_s23] sm:$0xff] %v1144_v50 }
 0x322   : > { %1552 = shalt.err (!%p1549_p3)
}
 0x323   : > { %s1553_s9 = scalar_lea.hbm %s1948_s21, 192  ;;  %s1557_s6 = scalar_lea.hbm %s1994_s4, 384 }
 0x324   : > { %p1554_p5 = scmp.ne.s32.totalorder %s1948_s21, %s1553_s9  ;;  %p1558_p4 = scmp.lt.s32.totalorder %s1948_s21, %s1994_s4 }
 0x325   : > { %p1559_p9 = scmp.lt.s32.totalorder %s1557_s6, %s1553_s9 }
 0x326   : > { %p1555_p7 = pnand %p1554_p5, %p1754_p0 }
 0x327   : > { %p1560_p10 = por %p1559_p9, %p1558_p4 }
 0x328   : > { %p1556_p6 = pneg %p1555_p7 }
 0x32a   : > { %p1561_p1 = pnand %p1560_p10, %p1556_p6 }
 0x32c   : > { %1564 = shalt.err (!%p1561_p1)
}
 0x32d   : > { %1371 = dma.vmem_to_hbm [thread:$0]  (%p1754_p0), %s1167_s27, 192, %s1948_s21, %s1150_s30  }
 0x32e PF: > { %s1178_s1 = sand.u32 1, %s1603_s15   ;;  %p2007_p8 = scmp.ne.s32.totalorder %s2000_s26, 0 }
 0x32f   : > { %p2008_p13 = scmp.ge.s32.totalorder %s1623_s20, 2  ;;  %s1179_s23 = scalar_lea.sflag [#allocation6], %s1178_s1 }
 0x331   : > { %p1382_p11 = pnand %p2008_p13, %p2007_p8 }
 0x333   : > { %p1383_p2 = pneg %p1382_p11 }
 0x335   : > { %1598 = dma.done.wait (%p1383_p2), %s1179_s23, 192  }
 0x336   : > { %1600 = vsyncadd (%p1383_p2), %s1179_s23, 4294967104  ;;  %s21_s20 = sadd.s32 1, %s1623_s20   ;;  %s2009_s15 = smov %s1607_s16 }
 0x337   : > { %p18_p12 = scmp.ge.s32.totalorder %s21_s20, 4   ;;  %s2010_s16 = smov %s1611_s17 }
 0x338   : > { %s2011_s17 = smov %s1760_s14  ;;  %s2012_s18 = smov %s1619_s19 }
 0x339   : > { %s2013_s19 = smov %s2015_s5  ;;  %20 = sbr.rel (!%p18_p12) target bundleno = 9 (0x9), region = 89 }
 0x33e   :  { %1184 = vsyncpa [#allocation5], 1 }
 0x33f   :  { %1186 = vsyncpa [#allocation5 + $0x1], 1 }
 0x340   :  { %1187 = vsyncpa [#allocation8], 1 }
 0x341   :  { %1188 = vsyncpa [#allocation6], 1 }
 0x342   :  { %1190 = vsyncpa [#allocation6 + $0x1], 1 }

</bundles_post_ra>
